<compile_context>
chip_gen: v5e
topology: v5e:2x2
jax: 0.10.0
libtpu: 0.0.40
codegen_flags: <defaults>
</compile_context>

<pallas_src>
import functools

import jax
import jax.numpy as jnp
import numpy as np
from jax.experimental import pallas as pl
from jax.experimental.pallas import tpu as pltpu


def _to_rgb_kernel(mod_w_ref, bias_ref, x_ref, out_ref, *, conv_clamp, t_b):
    # mod_w_ref: (T_B, Cout, Cin)  per-batch modulated 1x1 conv weight (x.dtype)
    # bias_ref:  (Cout, 1)         output bias (f32), broadcast over lanes
    # x_ref:     (T_B, Cin, T_HW)  input feature tile, HW on the lane axis
    # out_ref:   (T_B, Cout, T_HW) lane-dense output tile
    bias = bias_ref[...]                                     # (Cout, 1) f32
    for i in range(t_b):                                     # static unroll (t_b small)
        y = jnp.dot(mod_w_ref[i], x_ref[i],
                    preferred_element_type=jnp.float32)      # f32 accumulation on MXU
        y = y + bias                                         # bias_act, act='linear'
        if conv_clamp is not None:
            y = jnp.clip(y, -conv_clamp, conv_clamp)
        out_ref[i] = y.astype(out_ref.dtype)


def _vmem_capacity_bytes():
    """Physical VMEM of the local TensorCore; conservative v7x fallback (64 MiB)."""
    try:
        info = pltpu.get_tpu_info()
        for attr in ("vmem_capacity_bytes", "vmem_bytes", "vmem_size_bytes"):
            v = getattr(info, attr, None)
            if v:
                return int(v)
    except Exception:
        pass
    return 64 * 1024 * 1024


def _mul128_divisors(n, upper):
    """Divisors of n that are multiples of 128 and <= upper (ascending)."""
    out = []
    d = 128
    while d <= upper:
        if n % d == 0:
            out.append(d)
        d += 128
    return out


def _pick_tiles(B, HW, per_col_bytes, budget_bytes):
    """Choose (t_b, t_hw): t_hw divides HW and is a multiple of 128 (or HW itself);
    t_b divides B. Double-buffered working set kept under budget; keeps >=2 grid
    programs along a parallel axis where possible (v7x megacore)."""
    target = max(128, budget_bytes // max(per_col_bytes, 1))

    if HW <= target:
        t_hw = HW
    else:
        divs = _mul128_divisors(HW, min(target, HW))
        if divs:
            t_hw = divs[-1]
        else:
            # No legal tiled choice under budget: take the largest multiple-of-128
            # divisor at all, else the full axis (raise vmem_limit covers slack).
            divs = _mul128_divisors(HW, HW)
            t_hw = divs[-1] if divs else HW

    # v7x megacore: single image fully resident in one tile -> split HW into >=2 tiles.
    if B == 1 and HW // t_hw == 1 and HW >= 256:
        divs = _mul128_divisors(HW, HW - 1)   # proper divisors only
        if divs:
            t_hw = divs[-1]

    # Small-resolution layers: fold batch elements per step to amortize grid-step
    # overhead, but keep >=2 grid steps so both v7x TensorCores get work.
    t_b = 1
    if HW // t_hw == 1 and B > 1:
        cap = max(1, B // 2)
        for d in range(cap, 0, -1):
            if B % d == 0 and d * HW * per_col_bytes <= budget_bytes:
                t_b = d
                break

    return t_b, t_hw


def to_rgb_forward(x_nchw, w_latent, params, conv_clamp=None):
    """Pallas implementation of ToRGBLayer.forward (use_w=True, fused_modconv=True)."""
    B, Cin, H, W = x_nchw.shape
    HW = H * W
    w_dim = w_latent.shape[1]
    Cout = params["conv_weight"].shape[0]

    aff_w = params["aff_weight"].astype(jnp.float32)                  # (Cin, w_dim)
    aff_b = params["aff_bias"].astype(jnp.float32)                    # (Cin,)
    conv_w = params["conv_weight"][:, :, 0, 0].astype(jnp.float32)    # (Cout, Cin)
    bias = params["bias"].astype(jnp.float32).reshape(Cout, 1)        # (Cout, 1)

    aff_w_gain = float(1.0 / np.sqrt(w_dim))          # FullyConnectedLayer, lr_mult=1
    weight_gain = float(1.0 / np.sqrt(Cin * 1 * 1))   # ToRGBLayer, kernel_size=1

    # Hoisted per-batch modulation: styles and mod_w are tiny; one batched matmul
    # in XLA instead of per-spatial-tile recomputation inside the kernel.
    styles = (jnp.dot(w_latent.astype(jnp.float32), (aff_w * aff_w_gain).T)
              + aff_b[None, :]) * weight_gain                         # (B, Cin)
    mod_w = conv_w[None, :, :] * styles[:, None, :]                   # (B, Cout, Cin) f32
    # Match MXU operand dtypes (avoid promoting the big (Cin, T_HW) tile to f32).
    mod_w = mod_w.astype(x_nchw.dtype)

    # NCHW -> (B, Cin, HW): free reshape, HW lands on the lane dimension.
    x_flat = x_nchw.reshape(B, Cin, HW)

    x_itemsize = np.dtype(x_nchw.dtype).itemsize
    out_itemsize = x_itemsize
    # Double-buffered x + out, plus the f32 matmul intermediate.
    per_col = 2 * Cin * x_itemsize + 2 * Cout * out_itemsize + Cout * 4

    vmem_cap = _vmem_capacity_bytes()
    vmem_limit = (vmem_cap * 3) // 4          # ~48 MiB on v7x, ~96 MiB on v5e/v6e
    tile_budget = (vmem_limit * 2) // 3       # ~32 MiB on v7x, ~64 MiB on v5e/v6e

    t_b, t_hw = _pick_tiles(B, HW, per_col, tile_budget)
    grid = (B // t_b, HW // t_hw)

    kernel = functools.partial(_to_rgb_kernel, conv_clamp=conv_clamp, t_b=t_b)

    cost = pl.CostEstimate(
        flops=int(2 * B * HW * Cin * Cout),
        transcendentals=0,
        bytes_accessed=int(B * Cin * HW * x_itemsize + B * Cout * HW * out_itemsize
                           + mod_w.size * x_itemsize + bias.size * 4),
    )

    out_flat = pl.pallas_call(
        kernel,
        out_shape=jax.ShapeDtypeStruct((B, Cout, HW), x_nchw.dtype),
        grid_spec=pltpu.PrefetchScalarGridSpec(
            num_scalar_prefetch=0,
            grid=grid,
            in_specs=[
                # per-batch modulated weight (T_B, Cout, Cin)
                pl.BlockSpec((t_b, Cout, Cin), lambda b, t: (b, 0, 0)),
                # bias (Cout, 1), broadcast over lanes inside the kernel
                pl.BlockSpec((Cout, 1), lambda b, t: (0, 0)),
                # feature tile (T_B, Cin, T_HW), lane-dense
                pl.BlockSpec((t_b, Cin, t_hw), lambda b, t: (b, 0, t)),
            ],
            out_specs=pl.BlockSpec((t_b, Cout, t_hw), lambda b, t: (b, 0, t)),
        ),
        compiler_params=pltpu.CompilerParams(
            dimension_semantics=("parallel", "parallel"),
            vmem_limit_bytes=int(vmem_limit),
        ),
        cost_estimate=cost,
    )(mod_w, bias, x_flat)

    # (B, Cout, HW) -> NCHW: free reshape.
    return out_flat.reshape(B, Cout, H, W)


def to_rgb_reference(x_nchw, w_latent, params, conv_clamp=None):
    """Pure-JAX reference mirroring the PyTorch forward (for verification)."""
    B, Cin, H, W = x_nchw.shape
    w_dim = w_latent.shape[1]
    aff_w_gain = 1.0 / np.sqrt(w_dim)
    weight_gain = 1.0 / np.sqrt(Cin)

    styles = (w_latent.astype(jnp.float32)
              @ (params["aff_weight"].astype(jnp.float32) * aff_w_gain).T
              + params["aff_bias"].astype(jnp.float32)[None, :]) * weight_gain
    conv_w = params["conv_weight"][:, :, 0, 0].astype(jnp.float32)    # (Cout, Cin)
    out = jnp.einsum("oi,bi,bihw->bohw", conv_w, styles,
                     x_nchw.astype(jnp.float32))
    out = out + params["bias"].astype(jnp.float32)[None, :, None, None]
    if conv_clamp is not None:
        out = jnp.clip(out, -conv_clamp, conv_clamp)
    return out


if __name__ == "__main__":
    # Small shapes consistent with the module.
    B, Cin, Cout, H, W, w_dim = 2, 4, 3, 16, 16, 8

    key = jax.random.PRNGKey(0)
    k_x, k_w, k_aff, k_conv = jax.random.split(key, 4)

    x = jax.random.normal(k_x, (B, Cin, H, W), dtype=jnp.float32)      # NCHW input
    w_latent = jax.random.normal(k_w, (B, w_dim), dtype=jnp.float32)   # latent codes

    params = {
        # FullyConnectedLayer(w_dim, in_channels, bias_init=1), lr_multiplier=1
        "aff_weight": jax.random.normal(k_aff, (Cin, w_dim), dtype=jnp.float32),
        "aff_bias": jnp.full((Cin,), 1.0, dtype=jnp.float32),
        # torch.randn([out_channels, in_channels, 1, 1])
        "conv_weight": jax.random.normal(k_conv, (Cout, Cin, 1, 1), dtype=jnp.float32),
        # torch.zeros([out_channels])
        "bias": jnp.zeros((Cout,), dtype=jnp.float32),
    }

    # f32 path
    out = to_rgb_forward(x, w_latent, params, conv_clamp=None)
    out = jax.block_until_ready(out)
    ref = to_rgb_reference(x, w_latent, params, conv_clamp=None)
    np.testing.assert_allclose(np.asarray(out), np.asarray(ref),
                               rtol=1e-5, atol=1e-5)

    # conv_clamp path
    out_c = jax.block_until_ready(to_rgb_forward(x, w_latent, params, conv_clamp=0.5))
    ref_c = to_rgb_reference(x, w_latent, params, conv_clamp=0.5)
    np.testing.assert_allclose(np.asarray(out_c), np.asarray(ref_c),
                               rtol=1e-5, atol=1e-5)

    # bf16 feature-tower path (native bf16 MXU operands, f32 accumulation)
    x_bf16 = x.astype(jnp.bfloat16)
    out_b = jax.block_until_ready(to_rgb_forward(x_bf16, w_latent, params))
    assert out_b.dtype == jnp.bfloat16
    np.testing.assert_allclose(np.asarray(out_b, dtype=np.float32), np.asarray(ref),
                               rtol=5e-2, atol=5e-2)

    # TODO(synk): use_w=False and fused_modconv=False code paths of the PyTorch
    # module are not exercised by the default config and are not implemented here.
    print("KERNEL_OK")
</pallas_src>

<mosaic_0001>
module attributes {stable_mosaic.version = 11 : i64} {
  func.func @_to_rgb_kernel(%arg0: i32, %arg1: i32, %arg2: memref<1x3x4xf32, #tpu.memory_space<vmem>>, %arg3: memref<3x1xf32, #tpu.memory_space<vmem>>, %arg4: memref<1x4x256xf32, #tpu.memory_space<vmem>>, %arg5: memref<1x3x256xf32, #tpu.memory_space<vmem>>) attributes {dimension_semantics = [#tpu.dimension_semantics<parallel>, #tpu.dimension_semantics<parallel>], iteration_bounds = array<i64: 2, 1>, scalar_prefetch = 0 : i64, scratch_operands = 0 : i64, tpu.core_type = #tpu.core_type<tc>, window_params = [{transform_indices = @transform_0, window_bounds = array<i64: 1, 3, 4>}, {pipeline_mode = #tpu.pipeline_mode<synchronous>, transform_indices = @transform_1, window_bounds = array<i64: 3, 1>}, {transform_indices = @transform_2, window_bounds = array<i64: 1, 4, 256>}, {transform_indices = @transform_3, window_bounds = array<i64: 1, 3, 256>}]} {
    %c0 = arith.constant 0 : index
    %c0_0 = arith.constant 0 : index
    %0 = vector.load %arg3[%c0, %c0_0] : memref<3x1xf32, #tpu.memory_space<vmem>>, vector<3x1xf32>
    %c0_1 = arith.constant 0 : index
    %c0_2 = arith.constant 0 : index
    %c0_3 = arith.constant 0 : index
    %1 = vector.load %arg2[%c0_1, %c0_2, %c0_3] : memref<1x3x4xf32, #tpu.memory_space<vmem>>, vector<1x3x4xf32>
    %2 = vector.shape_cast %1 : vector<1x3x4xf32> to vector<3x4xf32>
    %c0_4 = arith.constant 0 : index
    %c0_5 = arith.constant 0 : index
    %c0_6 = arith.constant 0 : index
    %3 = vector.load %arg4[%c0_4, %c0_5, %c0_6] : memref<1x4x256xf32, #tpu.memory_space<vmem>>, vector<1x4x256xf32>
    %4 = vector.shape_cast %3 : vector<1x4x256xf32> to vector<4x256xf32>
    %cst = arith.constant dense<0.000000e+00> : vector<3x256xf32>
    %5 = tpu.matmul %2, %4, %cst {dimension_numbers = #tpu.dot_dimension_numbers<[1], [0], [0], [1], [0, 0, 1, 1], [], []>} : vector<3x4xf32>, vector<4x256xf32>, vector<3x256xf32> -> vector<3x256xf32>
    %6 = vector.broadcast %0 : vector<3x1xf32> to vector<3x256xf32>
    %7 = arith.addf %5, %6 : vector<3x256xf32>
    %c0_7 = arith.constant 0 : index
    %c0_8 = arith.constant 0 : index
    %c0_9 = arith.constant 0 : index
    %8 = vector.load %arg5[%c0_7, %c0_8, %c0_9] : memref<1x3x256xf32, #tpu.memory_space<vmem>>, vector<1x3x256xf32>
    %9 = vector.shape_cast %8 : vector<1x3x256xf32> to vector<3x256xf32>
    %10 = vector.shape_cast %7 : vector<3x256xf32> to vector<1x3x256xf32>
    tpu.vector_store %arg5[%c0_7, %c0_8, %c0_9], %10 {strides = array<i32>} : memref<1x3x256xf32, #tpu.memory_space<vmem>>, vector<1x3x256xf32>,
    return
  }
  func.func @transform_0(%arg0: i32, %arg1: i32) -> (i32, i32, i32) {
    %c0_i32 = arith.constant 0 : i32
    %c0_i32_0 = arith.constant 0 : i32
    %c0_i32_1 = arith.constant 0 : i32
    return %arg0, %c0_i32, %c0_i32_0 : i32, i32, i32
  }
  func.func @transform_1(%arg0: i32, %arg1: i32) -> (i32, i32) {
    %c0_i32 = arith.constant 0 : i32
    %c0_i32_0 = arith.constant 0 : i32
    %c0_i32_1 = arith.constant 0 : i32
    return %c0_i32, %c0_i32_0 : i32, i32
  }
  func.func @transform_2(%arg0: i32, %arg1: i32) -> (i32, i32, i32) {
    %c0_i32 = arith.constant 0 : i32
    %c0_i32_0 = arith.constant 0 : i32
    return %arg0, %c0_i32, %arg1 : i32, i32, i32
  }
  func.func @transform_3(%arg0: i32, %arg1: i32) -> (i32, i32, i32) {
    %c0_i32 = arith.constant 0 : i32
    %c0_i32_0 = arith.constant 0 : i32
    return %arg0, %c0_i32, %arg1 : i32, i32, i32
  }
}

</mosaic_0001>

<bundles_post_ra>
// kernel: tpu_custom_call.1
= control target key start
LH: loop header
LB: loop body
LE: loop exit
PB: predicated region body
PF: predicated region fallthrough
CT: control target
= control target key end

     0   :  { %s482_s12 = smov 0   ;;  %s484_s13 = smov 0   ;;  %s524_s0 = inlined_call_operand.vmem [shape: f32[2,3,4], index: 0, kind: input, shape index: {}]   ;;  %s525_s1 = inlined_call_operand.vmem [shape: f32[3,1], index: 1, kind: input, shape index: {}]   ;;  %s526_s2 = inlined_call_operand.vmem [shape: f32[2,4,256], index: 2, kind: input, shape index: {}]   ;;  %s527_s3 = inlined_call_operand.vmem [shape: f32[2,3,256], index: 3, kind: output, shape index: {}]  }
   0x1   :  { %s486_s14 = smov 0  }
   0x2 LB: > { %s25_s15 = sadd.s32 1, %s455_s13  ;;  %p397_p0 = scmp.ge.s32.totalorder %s459_s14, 1  ;;  %s459_s14 = sphi %s486_s14, %s13_s14   ;;  %s455_s13 = sphi %s484_s13, %s529_s13   ;;  %s451_s12 = sphi %s482_s12, %s528_s12  }
   0x3   : > { %p27_p1 = scmp.ge.s32.totalorder %s25_s15, 2  ;;  %p167_p2 = scmp.lt.s32.totalorder %s459_s14, 3 }
   0x5   : > { %s531_s15 = smov (%p27_p1, %s25_s15), 0  ;;  %p168_p3 = pnand %p397_p0, %p167_p2 }
   0x6   : > { %p203_p4 = scmp.lt.s32.totalorder (!%p168_p3), %s451_s12, 1 }
   0x7   : > { %171 = sbr.rel (%p168_p3) target bundleno = 157 (0x9d), region = 32 }
   0xc   : > { %v227_v0 = vld [vmem:[%s525_s1] sm:$0x7]  ;;  %v461_v1 = vmov 0   ;;  %s533_s12 = smov (!%p203_p4, %s451_s12), 1  ;;  %vm243_vm0 = vcmask 1043456   ;;  %vm239_vm1 = vcmask 31744  }
   0xd   : > { %436 = vset.pattern.permute.xlu0 %v461_v1  ;;  %s409_s18 = sshll.u32 %s533_s12, 3  ;;  %s398_s22 = sshll.u32 %s533_s12, 2 }
   0xe   : > { %232 = vperm.xlu0 %436, %v227_v0   ;;  %s215_s21 = scalar_lea.vmem %s526_s2, %s409_s18  ;;  %s206_s25 = scalar_lea.vmem %s524_s0, %s398_s22 }
   0xf   : > { %v229_v2 = vld [vmem:[%s215_s21] sm:$0xff]  ;;  %s225_s28 = scalar_lea.vmem %s527_s3, %s409_s18 }
  0x10   : > { %236 = vst [vmem:[#allocation1] ss:$2 sm:$0xff] %v229_v2  ;;  %v228_v3 = vld [vmem:[%s206_s25] sm:$0x7] }
  0x17   : > { %v237_v4 = vld.sshfl [vmem:[#allocation1] sm:$0xff pattern:$0x75316420]  ;;  %v238_v5 = vld.sshfl [vmem:[#allocation1 + $0x8] sm:$0xff pattern:$0x75316420] }
  0x18   : > { %403 = vmatpush.msk.msra.mxu0 %vm243_vm0, %v237_v4  ;;  %405 = vmatpush.msk.msra.mxu1 %vm243_vm0, %v238_v5 }
  0x19   : > { %404 = vmatmul.msk.f32.vlgmr.msra.gmra.mxu0 %vm239_vm1, %v228_v3  ;;  %406 = vmatmul.msk.f32.vlgmr.msra.gmra.mxu1 %vm239_vm1, %v228_v3 }
  0x80   : > { %v233_v6 = vpop.permute.xlu0 %232 }
  0x96   : > { %v265_v7 = vpop.f32.mrf.mxu0  ;;  %v285_v8 = vpop.f32.mrf.mxu1 }
  0x97   : > { %v286_v9 = vadd.f32 %v285_v8, %v233_v6  ;;  %v266_v10 = vadd.f32 %v265_v7, %v233_v6 }
  0x99   : > { %v290_v11 = vrot.slane %v286_v9, 4 }
  0x9b   : > { %v291_v12 = vsel %vm243_vm0, %v266_v10, %v290_v11 }
  0x9c   : > { %293 = vst [vmem:[%s225_s28] sm:$0x77] %v291_v12 }
  0x9d PF: > { %s13_s14 = sadd.s32 1, %s459_s14   ;;  %s528_s12 = smov %s455_s13 }
  0x9e   : > { %p10_p5 = scmp.ge.s32.totalorder %s13_s14, 4   ;;  %s529_s13 = smov %s531_s15 }
  0xa0   :  { %12 = sbr.rel (!%p10_p5) target bundleno = 2 (0x2), region = 65 }

</bundles_post_ra>
